<compile_context>
chip_gen: v7x
topology: tpu7x:2x2x1
jax: 0.10.0
libtpu: 0.0.40
codegen_flags: <defaults>
</compile_context>

<pallas_src>
import jax
import jax.numpy as jnp
from jax import lax
from jax.experimental import pallas as pl
from jax.experimental.pallas import tpu as pltpu


AUG_HIDDEN = 64   # signatory.Augment layer_sizes[0]
AUG_OUT = 32      # signatory.Augment layer_sizes[1] -> path channels d; sig_channels = d + d*d


# ---------------------------------------------------------------------------
# Fused kernel: augment -> depth-2 streamed signature (chunked scan) -> head
# ---------------------------------------------------------------------------

def _dst_decoder_kernel(x_ref, tril_ref, e_rep_ref, e_tile_ref,
                        wa1_ref, ba1_ref, wa2_ref, ba2_ref,
                        w1a_ref, w1b_ref, b1_ref, w2_ref, b2_ref,
                        o_ref, carry_y, carry_s2):
    c = pl.program_id(1)            # chunk index along the stream
    T = x_ref.shape[1]              # chunk length
    d = wa2_ref.shape[1]            # path channels (32)
    bf16 = jnp.bfloat16
    f32 = jnp.float32

    # Reset the scan carry at the start of every batch element (c == 0 also
    # covers batch transitions since the chunk axis is the innermost grid axis).
    @pl.when(c == 0)
    def _():
        carry_y[...] = jnp.zeros_like(carry_y)       # basepoint = 0
        carry_s2[...] = jnp.zeros_like(carry_s2)

    # ---- augment: Conv1x1(latent->64) -> ReLU -> Conv1x1(64->32), pointwise ----
    x = x_ref[0].astype(bf16)                                           # (T, latent)
    h1 = jnp.dot(x, wa1_ref[...], preferred_element_type=f32) + ba1_ref[...]
    h1 = jnp.maximum(h1, 0.0)                                           # (T, 64)
    y = jnp.dot(h1.astype(bf16), wa2_ref[...],
                preferred_element_type=f32) + ba2_ref[...]              # (T, d) path points

    # ---- in-chunk shift via XLU roll; first row takes the carried last point ---
    rolled = pltpu.roll(y, shift=1, axis=0)                             # y[t-1] for t>0
    row0 = lax.broadcasted_iota(jnp.int32, (T, d), 0) == 0
    prev = jnp.where(row0, jnp.broadcast_to(carry_y[...], (T, d)), rolled)

    delta = y - prev
    coeff = prev + 0.5 * delta                                          # Chen level-2 coeff

    # ---- level-2 increments: term[s, i*d+j] = coeff[s,i] * delta[s,j] ----------
    # lane-dense (T, d*d) slab via two matmuls against resident 0/1 expansion mats
    term = (jnp.dot(coeff.astype(bf16), e_rep_ref[...], preferred_element_type=f32) *
            jnp.dot(delta.astype(bf16), e_tile_ref[...], preferred_element_type=f32))

    # ---- streamed level-2 signature: local inclusive prefix sum + carried sig --
    s2 = jnp.dot(tril_ref[...], term.astype(bf16),
                 preferred_element_type=f32) + carry_s2[...]            # (T, d*d), f32 accum

    # update scan carries with the last row of this chunk
    carry_y[...] = y[T - 1:T, :]
    carry_s2[...] = s2[T - 1:T, :]

    # ---- head: linear1 split over [level-1 | level-2] -> ReLU -> linear2 -------
    # streamed level-1 signature with a zero basepoint is y itself.
    hid = (jnp.dot(y.astype(bf16), w1a_ref[...], preferred_element_type=f32)
           + jnp.dot(s2.astype(bf16), w1b_ref[...], preferred_element_type=f32)
           + b1_ref[...])
    hid = jnp.maximum(hid, 0.0)                                         # (T, H1)
    out = jnp.dot(hid.astype(bf16), w2_ref[...],
                  preferred_element_type=f32) + b2_ref[...]             # (T, out_dim)
    o_ref[0] = out.astype(o_ref.dtype)


def _pick_tile(L):
    for t in (256, 128, 64, 32, 16, 8):
        if L % t == 0:
            return t
    return L   # fallback: whole stream in one chunk (block == full dim is legal)


def dst_decoder_forward(params, x, tile_l=None):
    """x: (B, L, latent_dim) -> (B, L, output_dim)."""
    B, L, latent = x.shape
    d = AUG_OUT
    H1 = params["lin1_w"].shape[1]
    out_dim = params["lin2_w"].shape[1]

    T = tile_l if tile_l is not None else _pick_tile(L)
    assert L % T == 0, (L, T)
    C = L // T

    bf16, f32 = jnp.bfloat16, jnp.float32

    # grid-invariant structural matrices, built once on the host, resident in VMEM
    k = jnp.arange(d * d)
    i = jnp.arange(d)[:, None]
    e_rep = (k[None, :] // d == i).astype(bf16)            # (d, d*d): repeat coeff[i] d times
    e_tile = (k[None, :] % d == i).astype(bf16)            # (d, d*d): tile delta[j] d times
    r = jnp.arange(T)
    tril = (r[:, None] >= r[None, :]).astype(bf16)         # (T, T): inclusive cumsum

    # weights in bf16 (MXU fast path, f32 accumulation in-kernel); biases in f32
    wa1 = params["aug_w1"].astype(bf16)
    wa2 = params["aug_w2"].astype(bf16)
    w1a = params["lin1_w"][:d].astype(bf16)                # level-1 rows of linear1
    w1b = params["lin1_w"][d:].astype(bf16)                # level-2 rows of linear1
    w2 = params["lin2_w"].astype(bf16)
    ba1 = params["aug_b1"].reshape(1, -1).astype(f32)
    ba2 = params["aug_b2"].reshape(1, -1).astype(f32)
    b1 = params["lin1_b"].reshape(1, -1).astype(f32)
    b2 = params["lin2_b"].reshape(1, -1).astype(f32)

    def const(shape):
        # whole-array block with constant block index -> DMA'd once, stays resident
        return pl.BlockSpec(shape, lambda b, c: (0, 0))

    grid_spec = pltpu.PrefetchScalarGridSpec(
        num_scalar_prefetch=0,
        grid=(B, C),
        in_specs=[
            pl.BlockSpec((1, T, latent), lambda b, c: (b, c, 0)),   # x chunk
            const((T, T)),                                          # tril
            const((d, d * d)), const((d, d * d)),                   # e_rep, e_tile
            const((latent, AUG_HIDDEN)), const((1, AUG_HIDDEN)),    # augment conv1
            const((AUG_HIDDEN, d)), const((1, d)),                  # augment conv2
            const((d, H1)), const((d * d, H1)), const((1, H1)),     # linear1 (split) + bias
            const((H1, out_dim)), const((1, out_dim)),              # linear2
        ],
        out_specs=pl.BlockSpec((1, T, out_dim), lambda b, c: (b, c, 0)),
        scratch_shapes=[pltpu.VMEM((1, d), f32),          # carried last path point
                        pltpu.VMEM((1, d * d), f32)],     # carried level-2 signature
    )

    return pl.pallas_call(
        _dst_decoder_kernel,
        out_shape=jax.ShapeDtypeStruct((B, L, out_dim), f32),
        grid_spec=grid_spec,
        compiler_params=pltpu.CompilerParams(
            dimension_semantics=("parallel", "arbitrary")),
    )(x.astype(f32), tril, e_rep, e_tile, wa1, ba1, wa2, ba2,
      w1a, w1b, b1, w2, b2)


# ---------------------------------------------------------------------------
# Parameter init (matmul layout: (in, out)) and pure-JAX f32 reference
# ---------------------------------------------------------------------------

def init_params(key, latent_dim, output_dim, decoder_hidden_units=64):
    d = AUG_OUT
    sig_channels = d + d * d
    ks = jax.random.split(key, 8)

    def unif(k, shape, fan_in):
        bound = 1.0 / float(fan_in) ** 0.5
        return jax.random.uniform(k, shape, jnp.float32, -bound, bound)

    return {
        "aug_w1": unif(ks[0], (latent_dim, AUG_HIDDEN), latent_dim),
        "aug_b1": unif(ks[1], (AUG_HIDDEN,), latent_dim),
        "aug_w2": unif(ks[2], (AUG_HIDDEN, d), AUG_HIDDEN),
        "aug_b2": unif(ks[3], (d,), AUG_HIDDEN),
        "lin1_w": unif(ks[4], (sig_channels, decoder_hidden_units), sig_channels),
        "lin1_b": unif(ks[5], (decoder_hidden_units,), sig_channels),
        "lin2_w": unif(ks[6], (decoder_hidden_units, output_dim), decoder_hidden_units),
        "lin2_b": unif(ks[7], (output_dim,), decoder_hidden_units),
    }


def reference_forward(params, x):
    B, L, _ = x.shape
    d = AUG_OUT
    h1 = jax.nn.relu(x @ params["aug_w1"] + params["aug_b1"])
    y = h1 @ params["aug_w2"] + params["aug_b2"]                        # (B, L, d)
    prev = jnp.concatenate([jnp.zeros((B, 1, d)), y[:, :-1, :]], axis=1)
    delta = y - prev
    term = (prev[..., :, None] + 0.5 * delta[..., :, None]) * delta[..., None, :]
    s2 = jnp.cumsum(term, axis=1).reshape(B, L, d * d)
    sig = jnp.concatenate([y, s2], axis=-1)                             # (B, L, d + d*d)
    hid = jax.nn.relu(sig @ params["lin1_w"] + params["lin1_b"])
    return hid @ params["lin2_w"] + params["lin2_b"]


if __name__ == "__main__":
    latent_dim, output_dim, hidden = 32, 4, 64
    key = jax.random.PRNGKey(0)
    kp, kx1, kx2 = jax.random.split(key, 3)
    params = init_params(kp, latent_dim, output_dim, hidden)

    # Case 1: single chunk per batch element (B=2, L=8)
    x1 = jax.random.normal(kx1, (2, 8, latent_dim), jnp.float32)
    out1 = jax.block_until_ready(dst_decoder_forward(params, x1))
    ref1 = reference_forward(params, x1)
    assert out1.shape == (2, 8, output_dim), out1.shape
    assert bool(jnp.isfinite(out1).all())
    err1 = float(jnp.max(jnp.abs(out1 - ref1)))
    # bf16 MXU operands with f32 accumulation -> ~1e-3 expected deviation from f32 ref
    assert err1 < 2e-2, f"max abs err (single chunk) {err1}"

    # Case 2: exercise the chunked scan carry (B=2, L=16, two chunks of 8)
    x2 = jax.random.normal(kx2, (2, 16, latent_dim), jnp.float32)
    out2 = jax.block_until_ready(dst_decoder_forward(params, x2, tile_l=8))
    ref2 = reference_forward(params, x2)
    assert out2.shape == (2, 16, output_dim), out2.shape
    assert bool(jnp.isfinite(out2).all())
    err2 = float(jnp.max(jnp.abs(out2 - ref2)))
    assert err2 < 2e-2, f"max abs err (chunked scan) {err2}"

    print("KERNEL_OK")
</pallas_src>

<mosaic_0001>
module attributes {stable_mosaic.version = 11 : i64} {
  func.func @_dst_decoder_kernel(%arg0: i32, %arg1: i32, %arg2: memref<1x8x32xf32, #tpu.memory_space<vmem>>, %arg3: memref<8x8xbf16, #tpu.memory_space<vmem>>, %arg4: memref<32x1024xbf16, #tpu.memory_space<vmem>>, %arg5: memref<32x1024xbf16, #tpu.memory_space<vmem>>, %arg6: memref<32x64xbf16, #tpu.memory_space<vmem>>, %arg7: memref<1x64xf32, #tpu.memory_space<vmem>>, %arg8: memref<64x32xbf16, #tpu.memory_space<vmem>>, %arg9: memref<1x32xf32, #tpu.memory_space<vmem>>, %arg10: memref<32x64xbf16, #tpu.memory_space<vmem>>, %arg11: memref<1024x64xbf16, #tpu.memory_space<vmem>>, %arg12: memref<1x64xf32, #tpu.memory_space<vmem>>, %arg13: memref<64x4xbf16, #tpu.memory_space<vmem>>, %arg14: memref<1x4xf32, #tpu.memory_space<vmem>>, %arg15: memref<1x8x4xf32, #tpu.memory_space<vmem>>, %arg16: memref<1x32xf32, #tpu.memory_space<vmem>>, %arg17: memref<1x1024xf32, #tpu.memory_space<vmem>>) attributes {dimension_semantics = [#tpu.dimension_semantics<parallel>, #tpu.dimension_semantics<arbitrary>], iteration_bounds = array<i64: 2, 1>, scalar_prefetch = 0 : i64, scratch_operands = 2 : i64, tpu.core_type = #tpu.core_type<tc>, window_params = [{transform_indices = @transform_0, window_bounds = array<i64: 1, 8, 32>}, {pipeline_mode = #tpu.pipeline_mode<synchronous>, transform_indices = @transform_1, window_bounds = array<i64: 8, 8>}, {pipeline_mode = #tpu.pipeline_mode<synchronous>, transform_indices = @transform_2, window_bounds = array<i64: 32, 1024>}, {pipeline_mode = #tpu.pipeline_mode<synchronous>, transform_indices = @transform_3, window_bounds = array<i64: 32, 1024>}, {pipeline_mode = #tpu.pipeline_mode<synchronous>, transform_indices = @transform_4, window_bounds = array<i64: 32, 64>}, {pipeline_mode = #tpu.pipeline_mode<synchronous>, transform_indices = @transform_5, window_bounds = array<i64: 1, 64>}, {pipeline_mode = #tpu.pipeline_mode<synchronous>, transform_indices = @transform_6, window_bounds = array<i64: 64, 32>}, {pipeline_mode = #tpu.pipeline_mode<synchronous>, transform_indices = @transform_7, window_bounds = array<i64: 1, 32>}, {pipeline_mode = #tpu.pipeline_mode<synchronous>, transform_indices = @transform_8, window_bounds = array<i64: 32, 64>}, {pipeline_mode = #tpu.pipeline_mode<synchronous>, transform_indices = @transform_9, window_bounds = array<i64: 1024, 64>}, {pipeline_mode = #tpu.pipeline_mode<synchronous>, transform_indices = @transform_10, window_bounds = array<i64: 1, 64>}, {pipeline_mode = #tpu.pipeline_mode<synchronous>, transform_indices = @transform_11, window_bounds = array<i64: 64, 4>}, {pipeline_mode = #tpu.pipeline_mode<synchronous>, transform_indices = @transform_12, window_bounds = array<i64: 1, 4>}, {transform_indices = @transform_13, window_bounds = array<i64: 1, 8, 4>}]} {
    %c0_i32 = arith.constant 0 : i32
    %0 = arith.cmpi eq, %arg1, %c0_i32 : i32
    %1 = arith.extui %0 : i1 to i32
    %c0_i32_0 = arith.constant 0 : i32
    %2 = arith.cmpi ne, %1, %c0_i32_0 : i32
    scf.if %2 {
      %cst_49 = arith.constant 0.000000e+00 : f32
      %69 = vector.broadcast %cst_49 : f32 to vector<1x32xf32>
      %c0_50 = arith.constant 0 : index
      %c0_51 = arith.constant 0 : index
      %70 = vector.load %arg16[%c0_50, %c0_51] : memref<1x32xf32, #tpu.memory_space<vmem>>, vector<1x32xf32>
      tpu.vector_store %arg16[%c0_50, %c0_51], %69 {strides = array<i32>} : memref<1x32xf32, #tpu.memory_space<vmem>>, vector<1x32xf32>,
      %cst_52 = arith.constant 0.000000e+00 : f32
      %71 = vector.broadcast %cst_52 : f32 to vector<1x1024xf32>
      %c0_53 = arith.constant 0 : index
      %c0_54 = arith.constant 0 : index
      %72 = vector.load %arg17[%c0_53, %c0_54] : memref<1x1024xf32, #tpu.memory_space<vmem>>, vector<1x1024xf32>
      tpu.vector_store %arg17[%c0_53, %c0_54], %71 {strides = array<i32>} : memref<1x1024xf32, #tpu.memory_space<vmem>>, vector<1x1024xf32>,
    } else {
    }
    %c0 = arith.constant 0 : index
    %c0_1 = arith.constant 0 : index
    %c0_2 = arith.constant 0 : index
    %3 = vector.load %arg2[%c0, %c0_1, %c0_2] : memref<1x8x32xf32, #tpu.memory_space<vmem>>, vector<1x8x32xf32>
    %4 = vector.shape_cast %3 : vector<1x8x32xf32> to vector<8x32xf32>
    %5 = arith.truncf %4 : vector<8x32xf32> to vector<8x32xbf16>
    %c0_3 = arith.constant 0 : index
    %c0_4 = arith.constant 0 : index
    %6 = vector.load %arg6[%c0_3, %c0_4] : memref<32x64xbf16, #tpu.memory_space<vmem>>, vector<32x64xbf16>
    %cst = arith.constant dense<0.000000e+00> : vector<8x64xf32>
    %7 = tpu.matmul %5, %6, %cst {dimension_numbers = #tpu.dot_dimension_numbers<[1], [0], [0], [1], [0, 0, 1, 1], [], []>} : vector<8x32xbf16>, vector<32x64xbf16>, vector<8x64xf32> -> vector<8x64xf32>
    %c0_5 = arith.constant 0 : index
    %c0_6 = arith.constant 0 : index
    %8 = vector.load %arg7[%c0_5, %c0_6] : memref<1x64xf32, #tpu.memory_space<vmem>>, vector<1x64xf32>
    %9 = vector.broadcast %8 : vector<1x64xf32> to vector<8x64xf32>
    %10 = arith.addf %7, %9 : vector<8x64xf32>
    %cst_7 = arith.constant 0.000000e+00 : f32
    %11 = vector.broadcast %cst_7 : f32 to vector<8x64xf32>
    %12 = arith.maximumf %10, %11 : vector<8x64xf32>
    %13 = arith.truncf %12 : vector<8x64xf32> to vector<8x64xbf16>
    %c0_8 = arith.constant 0 : index
    %c0_9 = arith.constant 0 : index
    %14 = vector.load %arg8[%c0_8, %c0_9] : memref<64x32xbf16, #tpu.memory_space<vmem>>, vector<64x32xbf16>
    %cst_10 = arith.constant dense<0.000000e+00> : vector<8x32xf32>
    %15 = tpu.matmul %13, %14, %cst_10 {dimension_numbers = #tpu.dot_dimension_numbers<[1], [0], [0], [1], [0, 0, 1, 1], [], []>} : vector<8x64xbf16>, vector<64x32xbf16>, vector<8x32xf32> -> vector<8x32xf32>
    %c0_11 = arith.constant 0 : index
    %c0_12 = arith.constant 0 : index
    %16 = vector.load %arg9[%c0_11, %c0_12] : memref<1x32xf32, #tpu.memory_space<vmem>>, vector<1x32xf32>
    %17 = vector.broadcast %16 : vector<1x32xf32> to vector<8x32xf32>
    %18 = arith.addf %15, %17 : vector<8x32xf32>
    %c1_i32 = arith.constant 1 : i32
    %19 = tpu.dynamic_rotate %18 by %c1_i32 dim 0 : vector<8x32xf32>, i32 -> vector<8x32xf32>
    %20 = tpu.iota {dimensions = array<i32: 0>} : vector<8x32xi32>
    %c0_i32_13 = arith.constant 0 : i32
    %21 = vector.broadcast %c0_i32_13 : i32 to vector<8x32xi32>
    %22 = arith.cmpi eq, %20, %21 : vector<8x32xi32>
    %c0_14 = arith.constant 0 : index
    %c0_15 = arith.constant 0 : index
    %23 = vector.load %arg16[%c0_14, %c0_15] : memref<1x32xf32, #tpu.memory_space<vmem>>, vector<1x32xf32>
    %24 = vector.shape_cast %23 : vector<1x32xf32> to vector<1x32xf32>
    %25 = vector.broadcast %24 : vector<1x32xf32> to vector<8x32xf32>
    %26 = arith.select %22, %25, %19 : vector<8x32xi1>, vector<8x32xf32>
    %27 = arith.subf %18, %26 : vector<8x32xf32>
    %cst_16 = arith.constant 5.000000e-01 : f32
    %28 = vector.broadcast %cst_16 : f32 to vector<8x32xf32>
    %29 = arith.mulf %28, %27 : vector<8x32xf32>
    %30 = arith.addf %26, %29 : vector<8x32xf32>
    %31 = arith.truncf %30 : vector<8x32xf32> to vector<8x32xbf16>
    %c0_17 = arith.constant 0 : index
    %c0_18 = arith.constant 0 : index
    %32 = vector.load %arg4[%c0_17, %c0_18] : memref<32x1024xbf16, #tpu.memory_space<vmem>>, vector<32x1024xbf16>
    %cst_19 = arith.constant dense<0.000000e+00> : vector<8x1024xf32>
    %33 = tpu.matmul %31, %32, %cst_19 {dimension_numbers = #tpu.dot_dimension_numbers<[1], [0], [0], [1], [0, 0, 1, 1], [], []>} : vector<8x32xbf16>, vector<32x1024xbf16>, vector<8x1024xf32> -> vector<8x1024xf32>
    %34 = arith.truncf %27 : vector<8x32xf32> to vector<8x32xbf16>
    %c0_20 = arith.constant 0 : index
    %c0_21 = arith.constant 0 : index
    %35 = vector.load %arg5[%c0_20, %c0_21] : memref<32x1024xbf16, #tpu.memory_space<vmem>>, vector<32x1024xbf16>
    %cst_22 = arith.constant dense<0.000000e+00> : vector<8x1024xf32>
    %36 = tpu.matmul %34, %35, %cst_22 {dimension_numbers = #tpu.dot_dimension_numbers<[1], [0], [0], [1], [0, 0, 1, 1], [], []>} : vector<8x32xbf16>, vector<32x1024xbf16>, vector<8x1024xf32> -> vector<8x1024xf32>
    %37 = arith.mulf %33, %36 : vector<8x1024xf32>
    %c0_23 = arith.constant 0 : index
    %c0_24 = arith.constant 0 : index
    %38 = vector.load %arg3[%c0_23, %c0_24] : memref<8x8xbf16, #tpu.memory_space<vmem>>, vector<8x8xbf16>
    %39 = arith.truncf %37 : vector<8x1024xf32> to vector<8x1024xbf16>
    %cst_25 = arith.constant dense<0.000000e+00> : vector<8x1024xf32>
    %40 = tpu.matmul %38, %39, %cst_25 {dimension_numbers = #tpu.dot_dimension_numbers<[1], [0], [0], [1], [0, 0, 1, 1], [], []>} : vector<8x8xbf16>, vector<8x1024xbf16>, vector<8x1024xf32> -> vector<8x1024xf32>
    %c0_26 = arith.constant 0 : index
    %c0_27 = arith.constant 0 : index
    %41 = vector.load %arg17[%c0_26, %c0_27] : memref<1x1024xf32, #tpu.memory_space<vmem>>, vector<1x1024xf32>
    %42 = vector.broadcast %41 : vector<1x1024xf32> to vector<8x1024xf32>
    %43 = arith.addf %40, %42 : vector<8x1024xf32>
    %44 = vector.extract_strided_slice %18 {offsets = [7, 0], sizes = [1, 32], strides = [1, 1]} : vector<8x32xf32> to vector<1x32xf32>
    %c0_28 = arith.constant 0 : index
    %c0_29 = arith.constant 0 : index
    %45 = vector.load %arg16[%c0_28, %c0_29] : memref<1x32xf32, #tpu.memory_space<vmem>>, vector<1x32xf32>
    tpu.vector_store %arg16[%c0_28, %c0_29], %44 {strides = array<i32>} : memref<1x32xf32, #tpu.memory_space<vmem>>, vector<1x32xf32>,
    %46 = vector.extract_strided_slice %43 {offsets = [7, 0], sizes = [1, 1024], strides = [1, 1]} : vector<8x1024xf32> to vector<1x1024xf32>
    %c0_30 = arith.constant 0 : index
    %c0_31 = arith.constant 0 : index
    %47 = vector.load %arg17[%c0_30, %c0_31] : memref<1x1024xf32, #tpu.memory_space<vmem>>, vector<1x1024xf32>
    tpu.vector_store %arg17[%c0_30, %c0_31], %46 {strides = array<i32>} : memref<1x1024xf32, #tpu.memory_space<vmem>>, vector<1x1024xf32>,
    %48 = arith.truncf %18 : vector<8x32xf32> to vector<8x32xbf16>
    %c0_32 = arith.constant 0 : index
    %c0_33 = arith.constant 0 : index
    %49 = vector.load %arg10[%c0_32, %c0_33] : memref<32x64xbf16, #tpu.memory_space<vmem>>, vector<32x64xbf16>
    %cst_34 = arith.constant dense<0.000000e+00> : vector<8x64xf32>
    %50 = tpu.matmul %48, %49, %cst_34 {dimension_numbers = #tpu.dot_dimension_numbers<[1], [0], [0], [1], [0, 0, 1, 1], [], []>} : vector<8x32xbf16>, vector<32x64xbf16>, vector<8x64xf32> -> vector<8x64xf32>
    %51 = arith.truncf %43 : vector<8x1024xf32> to vector<8x1024xbf16>
    %c0_35 = arith.constant 0 : index
    %c0_36 = arith.constant 0 : index
    %52 = vector.load %arg11[%c0_35, %c0_36] : memref<1024x64xbf16, #tpu.memory_space<vmem>>, vector<1024x64xbf16>
    %cst_37 = arith.constant dense<0.000000e+00> : vector<8x64xf32>
    %53 = tpu.matmul %51, %52, %cst_37 {dimension_numbers = #tpu.dot_dimension_numbers<[1], [0], [0], [1], [0, 0, 1, 1], [], []>} : vector<8x1024xbf16>, vector<1024x64xbf16>, vector<8x64xf32> -> vector<8x64xf32>
    %54 = arith.addf %50, %53 : vector<8x64xf32>
    %c0_38 = arith.constant 0 : index
    %c0_39 = arith.constant 0 : index
    %55 = vector.load %arg12[%c0_38, %c0_39] : memref<1x64xf32, #tpu.memory_space<vmem>>, vector<1x64xf32>
    %56 = vector.broadcast %55 : vector<1x64xf32> to vector<8x64xf32>
    %57 = arith.addf %54, %56 : vector<8x64xf32>
    %cst_40 = arith.constant 0.000000e+00 : f32
    %58 = vector.broadcast %cst_40 : f32 to vector<8x64xf32>
    %59 = arith.maximumf %57, %58 : vector<8x64xf32>
    %60 = arith.truncf %59 : vector<8x64xf32> to vector<8x64xbf16>
    %c0_41 = arith.constant 0 : index
    %c0_42 = arith.constant 0 : index
    %61 = vector.load %arg13[%c0_41, %c0_42] : memref<64x4xbf16, #tpu.memory_space<vmem>>, vector<64x4xbf16>
    %cst_43 = arith.constant dense<0.000000e+00> : vector<8x4xf32>
    %62 = tpu.matmul %60, %61, %cst_43 {dimension_numbers = #tpu.dot_dimension_numbers<[1], [0], [0], [1], [0, 0, 1, 1], [], []>} : vector<8x64xbf16>, vector<64x4xbf16>, vector<8x4xf32> -> vector<8x4xf32>
    %c0_44 = arith.constant 0 : index
    %c0_45 = arith.constant 0 : index
    %63 = vector.load %arg14[%c0_44, %c0_45] : memref<1x4xf32, #tpu.memory_space<vmem>>, vector<1x4xf32>
    %64 = vector.broadcast %63 : vector<1x4xf32> to vector<8x4xf32>
    %65 = arith.addf %62, %64 : vector<8x4xf32>
    %c0_46 = arith.constant 0 : index
    %c0_47 = arith.constant 0 : index
    %c0_48 = arith.constant 0 : index
    %66 = vector.load %arg15[%c0_46, %c0_47, %c0_48] : memref<1x8x4xf32, #tpu.memory_space<vmem>>, vector<1x8x4xf32>
    %67 = vector.shape_cast %66 : vector<1x8x4xf32> to vector<8x4xf32>
    %68 = vector.shape_cast %65 : vector<8x4xf32> to vector<1x8x4xf32>
    tpu.vector_store %arg15[%c0_46, %c0_47, %c0_48], %68 {strides = array<i32>} : memref<1x8x4xf32, #tpu.memory_space<vmem>>, vector<1x8x4xf32>,
    return
  }
  func.func @transform_0(%arg0: i32, %arg1: i32) -> (i32, i32, i32) {
    %c0_i32 = arith.constant 0 : i32
    %c0_i32_0 = arith.constant 0 : i32
    return %arg0, %arg1, %c0_i32 : i32, i32, i32
  }
  func.func @transform_1(%arg0: i32, %arg1: i32) -> (i32, i32) {
    %c0_i32 = arith.constant 0 : i32
    %c0_i32_0 = arith.constant 0 : i32
    %c0_i32_1 = arith.constant 0 : i32
    return %c0_i32, %c0_i32_0 : i32, i32
  }
  func.func @transform_2(%arg0: i32, %arg1: i32) -> (i32, i32) {
    %c0_i32 = arith.constant 0 : i32
    %c0_i32_0 = arith.constant 0 : i32
    %c0_i32_1 = arith.constant 0 : i32
    return %c0_i32, %c0_i32_0 : i32, i32
  }
  func.func @transform_3(%arg0: i32, %arg1: i32) -> (i32, i32) {
    %c0_i32 = arith.constant 0 : i32
    %c0_i32_0 = arith.constant 0 : i32
    %c0_i32_1 = arith.constant 0 : i32
    return %c0_i32, %c0_i32_0 : i32, i32
  }
  func.func @transform_4(%arg0: i32, %arg1: i32) -> (i32, i32) {
    %c0_i32 = arith.constant 0 : i32
    %c0_i32_0 = arith.constant 0 : i32
    %c0_i32_1 = arith.constant 0 : i32
    return %c0_i32, %c0_i32_0 : i32, i32
  }
  func.func @transform_5(%arg0: i32, %arg1: i32) -> (i32, i32) {
    %c0_i32 = arith.constant 0 : i32
    %c0_i32_0 = arith.constant 0 : i32
    %c0_i32_1 = arith.constant 0 : i32
    return %c0_i32, %c0_i32_0 : i32, i32
  }
  func.func @transform_6(%arg0: i32, %arg1: i32) -> (i32, i32) {
    %c0_i32 = arith.constant 0 : i32
    %c0_i32_0 = arith.constant 0 : i32
    %c0_i32_1 = arith.constant 0 : i32
    return %c0_i32, %c0_i32_0 : i32, i32
  }
  func.func @transform_7(%arg0: i32, %arg1: i32) -> (i32, i32) {
    %c0_i32 = arith.constant 0 : i32
    %c0_i32_0 = arith.constant 0 : i32
    %c0_i32_1 = arith.constant 0 : i32
    return %c0_i32, %c0_i32_0 : i32, i32
  }
  func.func @transform_8(%arg0: i32, %arg1: i32) -> (i32, i32) {
    %c0_i32 = arith.constant 0 : i32
    %c0_i32_0 = arith.constant 0 : i32
    %c0_i32_1 = arith.constant 0 : i32
    return %c0_i32, %c0_i32_0 : i32, i32
  }
  func.func @transform_9(%arg0: i32, %arg1: i32) -> (i32, i32) {
    %c0_i32 = arith.constant 0 : i32
    %c0_i32_0 = arith.constant 0 : i32
    %c0_i32_1 = arith.constant 0 : i32
    return %c0_i32, %c0_i32_0 : i32, i32
  }
  func.func @transform_10(%arg0: i32, %arg1: i32) -> (i32, i32) {
    %c0_i32 = arith.constant 0 : i32
    %c0_i32_0 = arith.constant 0 : i32
    %c0_i32_1 = arith.constant 0 : i32
    return %c0_i32, %c0_i32_0 : i32, i32
  }
  func.func @transform_11(%arg0: i32, %arg1: i32) -> (i32, i32) {
    %c0_i32 = arith.constant 0 : i32
    %c0_i32_0 = arith.constant 0 : i32
    %c0_i32_1 = arith.constant 0 : i32
    return %c0_i32, %c0_i32_0 : i32, i32
  }
  func.func @transform_12(%arg0: i32, %arg1: i32) -> (i32, i32) {
    %c0_i32 = arith.constant 0 : i32
    %c0_i32_0 = arith.constant 0 : i32
    %c0_i32_1 = arith.constant 0 : i32
    return %c0_i32, %c0_i32_0 : i32, i32
  }
  func.func @transform_13(%arg0: i32, %arg1: i32) -> (i32, i32, i32) {
    %c0_i32 = arith.constant 0 : i32
    %c0_i32_0 = arith.constant 0 : i32
    return %arg0, %arg1, %c0_i32 : i32, i32, i32
  }
}

</mosaic_0001>

<bundles_post_ra>
// kernel: tpu_custom_call.1
= control target key start
LH: loop header
LB: loop body
LE: loop exit
PB: predicated region body
PF: predicated region fallthrough
CT: control target
= control target key end

     0   :  { %s2879_s25 = smov 0   ;;  %s2881_s26 = smov 0   ;;  %s3350_s0 = inlined_call_operand.vmem [shape: f32[2,8,32], index: 0, kind: input, shape index: {}]   ;;  %s3351_s1 = inlined_call_operand.vmem [shape: bf16[8,8], index: 1, kind: input, shape index: {}]   ;;  %s3352_s2 = inlined_call_operand.vmem [shape: bf16[32,1024], index: 2, kind: input, shape index: {}]   ;;  %s3353_s3 = inlined_call_operand.vmem [shape: bf16[32,1024], index: 3, kind: input, shape index: {}]   ;;  %s3354_s4 = inlined_call_operand.vmem [shape: bf16[32,64], index: 4, kind: input, shape index: {}]   ;;  %s3355_s5 = inlined_call_operand.vmem [shape: f32[1,64], index: 5, kind: input, shape index: {}]   ;;  %s3356_s6 = inlined_call_operand.vmem [shape: bf16[64,32], index: 6, kind: input, shape index: {}]   ;;  %s3357_s7 = inlined_call_operand.vmem [shape: f32[1,32], index: 7, kind: input, shape index: {}]   ;;  %s3358_s8 = inlined_call_operand.vmem [shape: bf16[32,64], index: 8, kind: input, shape index: {}]   ;;  %s3359_s9 = inlined_call_operand.vmem [shape: bf16[1024,64], index: 9, kind: input, shape index: {}]   ;;  %s3360_s10 = inlined_call_operand.vmem [shape: f32[1,64], index: 10, kind: input, shape index: {}]   ;;  %s3361_s11 = inlined_call_operand.vmem [shape: bf16[64,4], index: 11, kind: input, shape index: {}]   ;;  %s3362_s12 = inlined_call_operand.vmem [shape: f32[1,4], index: 12, kind: input, shape index: {}]   ;;  %s3363_s13 = inlined_call_operand.vmem [shape: f32[2,8,4], index: 13, kind: output, shape index: {}]  }
   0x1   :  { %s2883_s27 = smov 0  }
   0x2 LB: > { %s35_s28 = sadd.s32 1, %s2800_s26  ;;  %p2397_p0 = scmp.ge.s32.totalorder %s2804_s27, 1  ;;  %s2804_s27 = sphi %s2883_s27, %s23_s27   ;;  %s2800_s26 = sphi %s2881_s26, %s3365_s26   ;;  %s2796_s25 = sphi %s2879_s25, %s3364_s25  }
   0x3   : > { %p37_p1 = scmp.ge.s32.totalorder %s35_s28, 2  ;;  %p405_p2 = scmp.lt.s32.totalorder %s2804_s27, 3 }
   0x5   : > { %s3367_s28 = smov (%p37_p1, %s35_s28), 0  ;;  %p406_p3 = pnand %p2397_p0, %p405_p2 }
   0x6   : > { %v2706_v0 = vld [vmem:[%s3354_s4] sm:$0xff] (!%p406_p3)   ;;  %v2806_v1 = vmov (!%p406_p3), 0.0   ;;  %v2707_v2 = vld [vmem:[%s3354_s4 + $0x8] sm:$0xff] (!%p406_p3)   ;;  %vm2807_vm0 = vmmov (!%p406_p3), 0   ;;  %p453_p4 = scmp.lt.s32.totalorder (!%p406_p3), %s2796_s25, 1  ;;  %vm500_vm1 = vcmask (!%p406_p3), 261120   ;;  %v630_v42 = vlaneseq (!%p406_p3) }
   0x7   : > { %409 = sbr.rel (%p406_p3) target bundleno = 1398 (0x576), region = 72  ;;  %2639 = vmatprep.subr.bf16.mxu1 (!%p406_p3), %v2806_v1  ;;  %2643 = vmatprep.mubr.msk.bf16.mxu1 (!%p406_p3), %vm2807_vm0, %v2806_v1  ;;  %v2708_v3 = vld [vmem:[%s3356_s6] sm:$0xff] (!%p406_p3)   ;;  %v2709_v6 = vld [vmem:[%s3356_s6 + $0x8] sm:$0xff] (!%p406_p3)   ;;  %v2710_v7 = vld [vmem:[%s3356_s6 + $0x10] sm:$0xff] (!%p406_p3)   ;;  %vm472_vm2 = vcmask (!%p406_p3), 253952   ;;  %vm585_vm3 = vcmask (!%p406_p3), 523264  }
   0x8   : > { %2640 = vmatpush3.bf16.msra.mxu1 (!%p406_p3), %v2706_v0  ;;  %v2711_v8 = vld [vmem:[%s3356_s6 + $0x18] sm:$0xff] (!%p406_p3)   ;;  %473 = vst.msk [vmem:[#allocation2] sm:$0x1] (!%p406_p3), %vm472_vm2, %v2806_v1  ;;  %v2400_v9 = vld [vmem:[%s3355_s5] ss:$0 sm:$0xff] (!%p406_p3)  ;;  %v647_v19 = vld [vmem:[%s3352_s2 + $0x10] sm:$0xff] (!%p406_p3) }
   0x9   : > { %2641 = vmatprep.subr.bf16.mxu1 (!%p406_p3), %v2806_v1  ;;  %v645_v17 = vld [vmem:[%s3352_s2] sm:$0xff] (!%p406_p3)  ;;  %v651_v21 = vld [vmem:[%s3352_s2 + $0x30] sm:$0xff] (!%p406_p3)  ;;  %v2808_v33 = vmov (!%p406_p3), 0   ;;  %v646_v34 = vld [vmem:[%s3352_s2 + $0x8] sm:$0xff] (!%p406_p3)  ;;  %v2980_v44 = vshrl.u32 (!%p406_p3), %v630_v42, 7  ;;  %vm1424_vm4 = vcmask (!%p406_p3), 261127  }
   0xa   : > { %v649_v18 = vld [vmem:[%s3352_s2 + $0x20] sm:$0xff] (!%p406_p3)  ;;  %v2415_v22 = vcombine.low (!%p406_p3), %v647_v19, %v651_v21  ;;  %v2416_v23 = vcombine.high (!%p406_p3), %v647_v19, %v651_v21  ;;  %v655_v27 = vld [vmem:[%s3352_s2 + $0x50] sm:$0xff] (!%p406_p3)  ;;  %776 = vmatprep.mubr.bf16.mxu0 (!%p406_p3), %v2808_v33  ;;  %v650_v35 = vld [vmem:[%s3352_s2 + $0x28] sm:$0xff] (!%p406_p3)  ;;  %vm1235_vm6 = vcmask (!%p406_p3), 1043456   ;;  %vm1231_vm7 = vcmask (!%p406_p3), 64512  }
   0xb   : > { %v2412_v20 = vcombine.high (!%p406_p3), %v645_v17, %v649_v18  ;;  %v2411_v24 = vcombine.low (!%p406_p3), %v645_v17, %v649_v18  ;;  %v653_v25 = vld [vmem:[%s3352_s2 + $0x40] sm:$0xff] (!%p406_p3)  ;;  %v659_v29 = vld [vmem:[%s3352_s2 + $0x70] sm:$0xff] (!%p406_p3)  ;;  %v2414_v37 = vcombine.high (!%p406_p3), %v646_v34, %v650_v35  ;;  %v2413_v39 = vcombine.low (!%p406_p3), %v646_v34, %v650_v35  ;;  %v654_v55 = vld [vmem:[%s3352_s2 + $0x48] sm:$0xff] (!%p406_p3) }
   0xc   : > { %2642 = vmatpush3.bf16.msra.mxu1 (!%p406_p3), %v2707_v2  ;;  %v657_v26 = vld [vmem:[%s3352_s2 + $0x60] sm:$0xff] (!%p406_p3)  ;;  %v2423_v31 = vcombine.low (!%p406_p3), %v655_v27, %v659_v29  ;;  %v2424_v32 = vcombine.high (!%p406_p3), %v655_v27, %v659_v29  ;;  %vm632_vm5 = vcmp.eq.s32.totalorder (!%p406_p3), %v2980_v44, 0  ;;  %v658_v56 = vld [vmem:[%s3352_s2 + $0x68] sm:$0xff] (!%p406_p3)  ;;  %v648_v63 = vld [vmem:[%s3352_s2 + $0x18] sm:$0xff] (!%p406_p3)  ;;  %vm2317_vm8 = vcmask (!%p406_p3), 31744  }
   0xd   : > { %2647 = vmatprep.subr.bf16.mxu1 (!%p406_p3), %v2806_v1  ;;  %744 = vmatprep.subr.bf16.mxu0 (!%p406_p3), %v2412_v20  ;;  %v2420_v28 = vcombine.high (!%p406_p3), %v653_v25, %v657_v26  ;;  %v2419_v30 = vcombine.low (!%p406_p3), %v653_v25, %v657_v26  ;;  %v909_v36 = vld [vmem:[%s3353_s3] sm:$0xff] (!%p406_p3)  ;;  %v2422_v61 = vcombine.high (!%p406_p3), %v654_v55, %v658_v56  ;;  %v652_v0 = vld [vmem:[%s3352_s2 + $0x38] sm:$0xff] (!%p406_p3)  ;;  %v911_v2 = vld [vmem:[%s3353_s3 + $0x10] sm:$0xff] (!%p406_p3) }
   0xe   : > { %s3369_s25 = smov (!%p453_p4, %s2796_s25), 1  ;;  %745 = vmatpush1.bf16.msra.mxu0 %v2411_v24  ;;  %v913_v38 = vld [vmem:[%s3353_s3 + $0x20] sm:$0xff]  ;;  %v910_v17 = vld [vmem:[%s3353_s3 + $0x8] sm:$0xff]  ;;  %v912_v26 = vld [vmem:[%s3353_s3 + $0x18] sm:$0xff] }
   0xf   : > { %s2398_s16 = sshll.u32 %s3369_s25, 3  ;;  %746 = vmatprep.subr.bf16.mxu0 %v2420_v28  ;;  %v2431_v40 = vcombine.low %v909_v36, %v913_v38  ;;  %v2432_v41 = vcombine.high %v909_v36, %v913_v38  ;;  %v2404_v43 = vld [vmem:[%s3357_s7] ss:$0 sm:$0xff]  ;;  %v914_v18 = vld [vmem:[%s3353_s3 + $0x28] sm:$0xff]  ;;  %v916_v27 = vld [vmem:[%s3353_s3 + $0x38] sm:$0xff] }
  0x10   : > { %s459_s21 = scalar_lea.vmem %s3350_s0, %s2398_s16  ;;  %v2410_v46 = vld [vmem:[#allocation2] ss:$0 sm:$0xff]  ;;  %v2434_v21 = vcombine.high %v910_v17, %v914_v18  ;;  %v2433_v24 = vcombine.low %v910_v17, %v914_v18  ;;  %v2438_v29 = vcombine.high %v912_v26, %v916_v27  ;;  %s466_s15 = scalar_lea.vmem %s3363_s13, %s2398_s16 }
  0x11   : > { %v475_v4 = vld [vmem:[%s459_s21] sm:$0xff] }
  0x12   : > { %v476_v5 = vpack.c.bf16 %v475_v4, %v475_v4  ;;  %747 = vmatpush1.bf16.msra.mxu0 %v2419_v30  ;;  %v917_v57 = vld [vmem:[%s3353_s3 + $0x40] sm:$0xff]  ;;  %v2421_v4 = vcombine.low %v654_v55, %v658_v56  ;;  %v920_v30 = vld [vmem:[%s3353_s3 + $0x58] sm:$0xff] }
  0x13   : > { %785 = vmatprep.subr.bf16.mxu0 %v2414_v37  ;;  %v921_v58 = vld [vmem:[%s3353_s3 + $0x60] sm:$0xff] }
  0x14   : > { %2644 = vmatmul.mubr.msk.bf16.vlgmr.msra.gmra.mrb[0].mxu1 %vm500_vm1, %v476_v5  ;;  %v2440_v62 = vcombine.high %v917_v57, %v921_v58  ;;  %v2439_v5 = vcombine.low %v917_v57, %v921_v58 }
  0x15   : > { %2648 = vmatpush3.bf16.msra.mxu1 %v2708_v3  ;;  %2655 = vmatprep.mubr.msk.bf16.mxu1 %vm2807_vm0, %v2806_v1  ;;  %v915_v3 = vld [vmem:[%s3353_s3 + $0x30] sm:$0xff] }
  0x16   : > { %2649 = vmatprep.subr.bf16.mxu1 %v2806_v1 }
  0x19   : > { %2650 = vmatpush3.bf16.msra.mxu1 %v2709_v6  ;;  %v2418_v6 = vcombine.high %v648_v63, %v652_v0 }
  0x1a   : > { %2651 = vmatprep.subr.bf16.mxu1 %v2806_v1 }
  0x1d   : > { %2652 = vmatpush3.bf16.msra.mxu1 %v2710_v7  ;;  %v2436_v7 = vcombine.high %v911_v2, %v915_v3 }
  0x1e   : > { %2653 = vmatprep.subr.bf16.mxu1 %v2806_v1 }
  0x21   : > { %2654 = vmatpush3.bf16.msra.mxu1 %v2711_v8  ;;  %v656_v8 = vld [vmem:[%s3352_s2 + $0x58] sm:$0xff] }
  0x22   : > { %826 = vmatprep.subr.bf16.mxu1 %v2416_v23  ;;  %v922_v23 = vld [vmem:[%s3353_s3 + $0x68] sm:$0xff] }
  0xe7   : > { %v538_v10 = vpop.f32.mrb[0].mxu1 }
  0xe8   : > { %v539_v11 = vadd.f32 %v2400_v9, %v538_v10  ;;  %v2645_v12 = vpop.f32.mrb[1].mxu1  ;;  %v660_v9 = vld [vmem:[%s3352_s2 + $0x78] sm:$0xff]  ;;  %v919_v10 = vld [vmem:[%s3353_s3 + $0x50] sm:$0xff] }
  0xe9   : > { %v541_v13 = vpop.f32.mrb[2].mxu1  ;;  %v2417_v12 = vcombine.low %v648_v63, %v652_v0  ;;  %v2425_v19 = vcombine.low %v656_v8, %v660_v9 }
  0xea   : > { %v544_v14 = vmax.f32 %v539_v11, 0.0  ;;  %v2646_v15 = vpop.f32.mrb[3].mxu1  ;;  %v923_v11 = vld [vmem:[%s3353_s3 + $0x70] sm:$0xff]  ;;  %v2435_v13 = vcombine.low %v911_v2, %v915_v3 }
  0xeb   : > { %v2426_v15 = vcombine.high %v656_v8, %v660_v9  ;;  %v2443_v20 = vcombine.low %v919_v10, %v923_v11  ;;  %v2712_v9 = vld [vmem:[%s3359_s9 + $0x40] sm:$0xff]  }
  0xec   : > { %v545_v16 = vpack.c.bf16 %v544_v14, %v544_v14 }
  0xee   : > { %2656 = vmatmul.mubr.msk.bf16.vlgmr.msra.gmra.mrb[4].mxu1 %vm585_vm3, %v545_v16  ;;  %v2444_v16 = vcombine.high %v919_v10, %v923_v11  ;;  %v2713_v11 = vld [vmem:[%s3359_s9] sm:$0xff]  }
  0xef   : > { %827 = vmatpush1.bf16.msra.mxu1 %v2415_v22  ;;  %858 = vmatprep.mubr.bf16.mxu1 %v2808_v33  ;;  %v918_v22 = vld [vmem:[%s3353_s3 + $0x48] sm:$0xff] }
  0xf0   : > { %828 = vmatprep.subr.bf16.mxu1 %v2424_v32  ;;  %v2442_v25 = vcombine.high %v918_v22, %v922_v23  ;;  %v2441_v28 = vcombine.low %v918_v22, %v922_v23  ;;  %v2437_v32 = vcombine.low %v912_v26, %v916_v27  ;;  %v2716_v22 = vld [vmem:[%s3359_s9 + $0x50] sm:$0xff]   ;;  %v2718_v26 = vld [vmem:[%s3359_s9 + $0x58] sm:$0xff]  }
  0xf3   : > { %829 = vmatpush1.bf16.msra.mxu1 %v2423_v31  ;;  %v924_v31 = vld [vmem:[%s3353_s3 + $0x78] sm:$0xff] }
  0xf4   : > { %1008 = vmatprep.subr.bf16.mxu1 %v2432_v41  ;;  %v2446_v34 = vcombine.high %v920_v30, %v924_v31  ;;  %v2445_v35 = vcombine.low %v920_v30, %v924_v31 }
 0x1c1   : > { %v623_v45 = vpop.f32.mrb[4].mxu1 }
 0x1c2   : > { %v2982_v47 = vadd.f32 %v2404_v43, %v623_v45  ;;  %v2657_v48 = vpop.f32.mrb[5].mxu1 }
 0x1c3   : > { %v626_v49 = vpop.f32.mrb[6].mxu1 }
 0x1c4   : > { %v629_v50 = vrot.slane %v2982_v47, 7  ;;  %1425 = vst.msk [vmem:[#allocation2 - $0x7] sm:$0x80] %vm1424_vm4, %v2982_v47  ;;  %v2658_v51 = vpop.f32.mrb[7].mxu1 }
 0x1c6   : > { %v640_v52 = vsel %vm632_vm5, %v2410_v46, %v629_v50 }
 0x1c7   : > { %v641_v53 = vsub.f32 %v2982_v47, %v640_v52 }
 0x1c9   : > { %v642_v54 = vmul.f32 0.5, %v641_v53  ;;  %v908_v14 = vpack.c.bf16 %v641_v53, %v641_v53 }
 0x1cb   : > { %v643_v59 = vadd.f32 %v642_v54, %v640_v52 }
 0x1cd   : > { %v644_v60 = vpack.c.bf16 %v643_v59, %v643_v59  ;;  %v3069_v59 = vld [vmem:[%s3351_s1] sm:$0xf] }
 0x1cf   : > { %2427 = vmatmul.mubr.msk.bf16.vlgmr.msra.gmra.mrb[0].mxu0 %vm500_vm1, %v644_v60  ;;  %2429 = vmatmul.mubr.msk.bf16.vlgmr.msra.gmra.mrb[8].mxu1 %vm500_vm1, %v644_v60 }
 0x1d0   : > { %786 = vmatpush1.bf16.msra.mxu0 %v2413_v39  ;;  %1009 = vmatpush1.bf16.msra.mxu1 %v2431_v40 }
 0x1d1   : > { %787 = vmatprep.subr.bf16.mxu0 %v2422_v61  ;;  %1010 = vmatprep.subr.bf16.mxu1 %v2440_v62 }
 0x1d2   : > { %817 = vmatprep.mubr.bf16.mxu0 %v2808_v33  ;;  %1040 = vmatprep.mubr.bf16.mxu1 %v2808_v33 }
 0x1d4   : > { %788 = vmatpush1.bf16.msra.mxu0 %v2421_v4  ;;  %1011 = vmatpush1.bf16.msra.mxu1 %v2439_v5 }
 0x1d5   : > { %867 = vmatprep.subr.bf16.mxu0 %v2418_v6  ;;  %1090 = vmatprep.subr.bf16.mxu1 %v2436_v7 }
 0x1d7   : > { %2428 = vmatmul.mubr.msk.bf16.vlgmr.msra.gmra.mrb[4].mxu0 %vm500_vm1, %v644_v60  ;;  %2447 = vmatmul.mubr.msk.bf16.vlgmr.msra.gmra.mrb[12].mxu1 %vm500_vm1, %v908_v14 }
 0x1d8   : > { %868 = vmatpush1.bf16.msra.mxu0 %v2417_v12  ;;  %1091 = vmatpush1.bf16.msra.mxu1 %v2435_v13  ;;  %v2714_v13 = vld [vmem:[%s3359_s9 + $0x48] sm:$0xff]  }
 0x1d9   : > { %869 = vmatprep.subr.bf16.mxu0 %v2426_v15  ;;  %1092 = vmatprep.subr.bf16.mxu1 %v2444_v16 }
 0x1da   : > { %899 = vmatprep.mubr.bf16.mxu0 %v2808_v33  ;;  %1122 = vmatprep.mubr.bf16.mxu1 %v2808_v33 }
 0x1dc   : > { %870 = vmatpush1.bf16.msra.mxu0 %v2425_v19  ;;  %1093 = vmatpush1.bf16.msra.mxu1 %v2443_v20  ;;  %v2715_v20 = vld [vmem:[%s3359_s9 + $0x8] sm:$0xff]  }
 0x1dd   : > { %1049 = vmatprep.subr.bf16.mxu0 %v2434_v21 }
 0x1df   : > { %2430 = vmatmul.mubr.msk.bf16.vlgmr.msra.gmra.mrb[8].mxu0 %vm500_vm1, %v644_v60  ;;  %2449 = vmatmul.mubr.msk.bf16.vlgmr.msra.gmra.mrb[16].mxu1 %vm500_vm1, %v908_v14 }
 0x1e0   : > { %1050 = vmatpush1.bf16.msra.mxu0 %v2433_v24  ;;  %1081 = vmatprep.mubr.bf16.mxu0 %v2808_v33  ;;  %v2717_v24 = vld [vmem:[%s3359_s9 + $0x10] sm:$0xff]  }
 0x1e1   : > { %1051 = vmatprep.subr.bf16.mxu0 %v2442_v25  ;;  %1292 = vmatprep.mubr.bf16.mxu1 %v2808_v33 }
 0x1e4   : > { %1052 = vmatpush1.bf16.msra.mxu0 %v2441_v28 }
 0x1e5   : > { %1131 = vmatprep.subr.bf16.mxu0 %v2438_v29 }
 0x1e7   : > { %2448 = vmatmul.mubr.msk.bf16.vlgmr.msra.gmra.mrb[12].mxu0 %vm500_vm1, %v908_v14 }
 0x1e8   : > { %1132 = vmatpush1.bf16.msra.mxu0 %v2437_v32  ;;  %1163 = vmatprep.mubr.bf16.mxu0 %v2808_v33 }
 0x1e9   : > { %1133 = vmatprep.subr.bf16.mxu0 %v2446_v34  ;;  %v2719_v34 = vld [vmem:[%s3359_s9 + $0x18] sm:$0xff]  }
 0x1ec   : > { %1134 = vmatpush1.bf16.msra.mxu0 %v2445_v35 }
 0x1ef   : > { %2450 = vmatmul.mubr.msk.bf16.vlgmr.msra.gmra.mrb[16].mxu0 %vm500_vm1, %v908_v14 }
 0x1f0   : > { %1333 = vmatprep.mubr.bf16.mxu0 %v2808_v33 }
 0x2a2   : > { %v778_v36 = vpop.f32.mrb[0].mxu0  ;;  %v860_v37 = vpop.f32.mrb[8].mxu1 }
 0x2a3   : > { %v780_v38 = vpop.f32.mrb[1].mxu0  ;;  %v862_v39 = vpop.f32.mrb[9].mxu1 }
 0x2a4   : > { %v782_v40 = vpop.f32.mrb[2].mxu0  ;;  %v864_v41 = vpop.f32.mrb[10].mxu1 }
 0x2a5   : > { %v783_v42 = vpop.f32.mrb[3].mxu0  ;;  %v865_v43 = vpop.f32.mrb[11].mxu1  ;;  %v2724_v40 = vld [vmem:[%s3359_s9 + $0x68] sm:$0xff]  }
 0x2a6   : > { %v2725_v41 = vld [vmem:[%s3359_s9 + $0xc8] sm:$0xff]  }
 0x2a7   : > { %v2726_v42 = vld [vmem:[%s3359_s9 + $0x28] sm:$0xff]  }
 0x2a8   : > { %v2727_v43 = vld [vmem:[%s3359_s9 + $0x88] sm:$0xff]  }
 0x2aa   : > { %v819_v45 = vpop.f32.mrb[4].mxu0  ;;  %v1042_v46 = vpop.f32.mrb[12].mxu1 }
 0x2ab   : > { %v1172_v48 = vmul.f32 %v1042_v46, %v778_v36  ;;  %v821_v49 = vpop.f32.mrb[5].mxu0  ;;  %v1044_v50 = vpop.f32.mrb[13].mxu1  ;;  %v2720_v36 = vld [vmem:[%s3359_s9 + $0x60] sm:$0xff]   ;;  %v2729_v46 = vld [vmem:[%s3359_s9 + $0xd0] sm:$0xff]  }
 0x2ac   : > { %v1173_v51 = vmul.f32 %v1044_v50, %v780_v38  ;;  %v823_v52 = vpop.f32.mrb[6].mxu0  ;;  %v1046_v53 = vpop.f32.mrb[14].mxu1  ;;  %v2732_v50 = vld [vmem:[%s3359_s9 + $0x78] sm:$0xff]  }
 0x2ad   : > { %v1181_v54 = vpack.c.bf16 %v1172_v48, %v1172_v48  ;;  %v824_v55 = vpop.f32.mrb[7].mxu0  ;;  %v1047_v56 = vpop.f32.mrb[15].mxu1  ;;  %v2730_v48 = vld [vmem:[%s3359_s9 + $0x30] sm:$0xff]   ;;  %v2734_v52 = vld [vmem:[%s3359_s9 + $0x38] sm:$0xff]  }
 0x2ae   : > { %v1182_v57 = vpack.c.bf16 %v1173_v51, %v1173_v51  ;;  %v2733_v51 = vld [vmem:[%s3359_s9 + $0xd8] sm:$0xff]   ;;  %v2737_v55 = vld [vmem:[%s3359_s9 + $0x140] sm:$0xff]  }
 0x2af   : > { %v1237_v58 = vsel %vm1235_vm6, %v1181_v54, 0  ;;  %v2735_v53 = vld [vmem:[%s3359_s9 + $0x98] sm:$0xff]   ;;  %v2736_v54 = vld [vmem:[%s3359_s9 + $0xe0] sm:$0xff]  }
 0x2b0   : > { %2451 = vmatprep.subr.msk.bf16.mxu1 %vm1235_vm6, %v1182_v57  ;;  %v2738_v56 = vld [vmem:[%s3359_s9 + $0xa0] sm:$0xff]   ;;  %v2740_v57 = vld [vmem:[%s3359_s9 + $0xe8] sm:$0xff]  }
 0x2b1   : > { %1261 = vmatpush1.bf16.msra.mxu1 %v1237_v58  ;;  %v2742_v58 = vld [vmem:[%s3359_s9 + $0xa8] sm:$0xff]  }
 0x2b2   : > { %v901_v60 = vpop.f32.mrb[8].mxu0  ;;  %v1124_v61 = vpop.f32.mrb[16].mxu1 }
 0x2b3   : > { %v1176_v62 = vmul.f32 %v1124_v61, %v860_v37  ;;  %v903_v63 = vpop.f32.mrb[9].mxu0  ;;  %v1126_v0 = vpop.f32.mrb[17].mxu1  ;;  %v2721_v37 = vld [vmem:[%s3359_s9 + $0xc0] sm:$0xff]   ;;  %v2748_v61 = vld [vmem:[%s3359_s9 + $0xf8] sm:$0xff]  }
 0x2b4   : > { %v1177_v2 = vmul.f32 %v1126_v0, %v862_v39  ;;  %v905_v3 = vpop.f32.mrb[10].mxu0  ;;  %v1128_v4 = vpop.f32.mrb[18].mxu1  ;;  %2452 = vmatmul.mubr.msk.bf16.vlgmr.msra.gmra.mrb[20].mxu1 %vm1231_vm7, %v3069_v59  ;;  %v2723_v39 = vld [vmem:[%s3359_s9 + $0x80] sm:$0xff]   ;;  %v1193_v0 = vsub.s32 0, %v2980_v44 }
 0x2b5   : > { %v1185_v5 = vpack.c.bf16 %v1176_v62, %v1176_v62  ;;  %v906_v6 = vpop.f32.mrb[11].mxu0  ;;  %v1129_v7 = vpop.f32.mrb[19].mxu1  ;;  %1374 = vmatprep.mubr.bf16.mxu1 %v2808_v33  ;;  %v2750_v62 = vld [vmem:[%s3359_s9 + $0xb8] sm:$0xff]  }
 0x2b6   : > { %v1186_v8 = vpack.c.bf16 %v1177_v2, %v1177_v2  ;;  %v1197_v2 = vsub.s32 1, %v2980_v44  ;;  %v1194_v3 = vrot.slane %v2806_v1, %v1193_v0  ;;  %v2765_v0 = vld [vmem:[%s3359_s9 + $0x1d8] sm:$0xff]  }
 0x2b7   : > { %v1249_v10 = vsel %vm1235_vm6, %v1185_v5, 0 }
 0x2b8   : > { %2455 = vmatprep.subr.msk.bf16.mxu1 %vm1235_vm6, %v1186_v8  ;;  %v1198_v4 = vrot.slane %v2806_v1, %v1197_v2 }
 0x2b9   : > { %1343 = vmatpush1.bf16.msra.mxu1 %v1249_v10  ;;  %v1213_v10 = vsub.s32 5, %v2980_v44 }
 0x2ba   : > { %v1083_v12 = vpop.f32.mrb[12].mxu0  ;;  %2543 = vmatprep.subr.bf16.mxu1 %v2712_v9 }
 0x2bb   : > { %v1174_v14 = vmul.f32 %v1083_v12, %v819_v45  ;;  %v1085_v15 = vpop.f32.mrb[13].mxu0  ;;  %v2728_v45 = vld [vmem:[%s3359_s9 + $0x70] sm:$0xff]  }
 0x2bc   : > { %v1175_v16 = vmul.f32 %v1085_v15, %v821_v49  ;;  %v1087_v17 = vpop.f32.mrb[14].mxu0  ;;  %2456 = vmatmul.mubr.msk.bf16.vlgmr.msra.gmra.mrb[24].mxu1 %vm1231_vm7, %v3069_v59  ;;  %v2731_v49 = vld [vmem:[%s3359_s9 + $0x90] sm:$0xff]   ;;  %v2741_v15 = vld [vmem:[%s3359_s9 + $0x148] sm:$0xff]  }
 0x2bd   : > { %v1183_v18 = vpack.c.bf16 %v1174_v14, %v1174_v14  ;;  %v1088_v19 = vpop.f32.mrb[15].mxu0  ;;  %2544 = vmatpush3.bf16.msra.mxu1 %v2713_v11  ;;  %v2739_v14 = vld [vmem:[%s3359_s9 + $0x100] sm:$0xff]   ;;  %v2743_v17 = vld [vmem:[%s3359_s9 + $0x108] sm:$0xff]  }
 0x2be   : > { %v1184_v21 = vpack.c.bf16 %v1175_v16, %v1175_v16  ;;  %2545 = vmatprep.subr.bf16.mxu1 %v2714_v13  ;;  %v1214_v16 = vrot.slane %v2806_v1, %v1213_v10  ;;  %v2745_v19 = vld [vmem:[%s3359_s9 + $0x150] sm:$0xff]   ;;  %v2772_v10 = vld [vmem:[%s3359_s9 + $0x1a8] sm:$0xff]  }
 0x2bf   : > { %v1243_v23 = vsel %vm1235_vm6, %v1183_v18, 0 }
 0x2c0   : > { %2453 = vmatprep.subr.msk.bf16.mxu0 %vm1235_vm6, %v1184_v21 }
 0x2c1   : > { %1302 = vmatpush1.bf16.msra.mxu0 %v1243_v23  ;;  %2546 = vmatpush3.bf16.msra.mxu1 %v2715_v20  ;;  %v1201_v20 = vsub.s32 2, %v2980_v44 }
 0x2c2   : > { %v1165_v25 = vpop.f32.mrb[16].mxu0  ;;  %2547 = vmatprep.subr.bf16.mxu1 %v2716_v22  ;;  %v1205_v22 = vsub.s32 3, %v2980_v44 }
 0x2c3   : > { %v1178_v27 = vmul.f32 %v1165_v25, %v901_v60  ;;  %v1167_v28 = vpop.f32.mrb[17].mxu0  ;;  %v2746_v60 = vld [vmem:[%s3359_s9 + $0xb0] sm:$0xff]  }
 0x2c4   : > { %v1179_v29 = vmul.f32 %v1167_v28, %v903_v63  ;;  %v1169_v30 = vpop.f32.mrb[18].mxu0  ;;  %2454 = vmatmul.mubr.msk.bf16.vlgmr.msra.gmra.mrb[20].mxu0 %vm1231_vm7, %v3069_v59  ;;  %v2753_v63 = vld [vmem:[%s3359_s9 + $0x1c0] sm:$0xff]   ;;  %v1202_v28 = vrot.slane %v2806_v1, %v1201_v20  ;;  %v2779_v20 = vld [vmem:[%s3361_s11 + $0x8] sm:$0xff]  }
 0x2c5   : > { %v1187_v31 = vpack.c.bf16 %v1178_v27, %v1178_v27  ;;  %v1170_v32 = vpop.f32.mrb[19].mxu0  ;;  %1415 = vmatprep.mubr.bf16.mxu0 %v2808_v33  ;;  %2548 = vmatpush3.bf16.msra.mxu1 %v2717_v24  ;;  %v2722_v33 = vld [vmem:[%s3359_s9 + $0x20] sm:$0xff]   ;;  %v1206_v30 = vrot.slane %v2806_v1, %v1205_v22  ;;  %v2781_v22 = vld [vmem:[%s3361_s11 + $0x18] sm:$0xff]  }
 0x2c6   : > { %v1188_v35 = vpack.c.bf16 %v1179_v29, %v1179_v29  ;;  %2549 = vmatprep.subr.bf16.mxu1 %v2718_v26  ;;  %v2747_v26 = vld [vmem:[%s3359_s9 + $0x110] sm:$0xff]   ;;  %v2749_v29 = vld [vmem:[%s3359_s9 + $0x158] sm:$0xff]  }
 0x2c7   : > { %v1255_v38 = vsel %vm1235_vm6, %v1187_v31, 0  ;;  %v2751_v32 = vld [vmem:[%s3359_s9 + $0x118] sm:$0xff]  }
 0x2c8   : > { %2457 = vmatprep.subr.msk.bf16.mxu0 %vm1235_vm6, %v1188_v35 }
 0x2c9   : > { %1384 = vmatpush1.bf16.msra.mxu0 %v1255_v38  ;;  %2550 = vmatpush3.bf16.msra.mxu1 %v2719_v34 }
 0x2ca   : > { %2551 = vmatprep.subr.bf16.mxu1 %v2720_v36  ;;  %2565 = vmatprep.subr.bf16.mxu0 %v2721_v37  ;;  %v2752_v36 = vld [vmem:[%s3359_s9 + $0x160] sm:$0xff]  }
 0x2cc   : > { %2458 = vmatmul.mubr.msk.bf16.vlgmr.msra.gmra.mrb[24].mxu0 %vm1231_vm7, %v3069_v59  ;;  %v2744_v59 = vld [vmem:[%s3359_s9 + $0xf0] sm:$0xff]  }
 0x2cd   : > { %2552 = vmatpush3.bf16.msra.mxu1 %v2722_v33  ;;  %2566 = vmatpush3.bf16.msra.mxu0 %v2723_v39  ;;  %v1221_v33 = vsub.s32 7, %v2980_v44 }
 0x2ce   : > { %2553 = vmatprep.subr.bf16.mxu1 %v2724_v40  ;;  %2567 = vmatprep.subr.bf16.mxu0 %v2725_v41  ;;  %v2754_v41 = vld [vmem:[%s3359_s9 + $0x120] sm:$0xff]  }
 0x2d1   : > { %2554 = vmatpush3.bf16.msra.mxu1 %v2726_v42  ;;  %2568 = vmatpush3.bf16.msra.mxu0 %v2727_v43  ;;  %v2755_v42 = vld [vmem:[%s3359_s9 + $0x180] sm:$0xff]  }
 0x2d2   : > { %2555 = vmatprep.subr.bf16.mxu1 %v2728_v45  ;;  %2569 = vmatprep.subr.bf16.mxu0 %v2729_v46  ;;  %v2756_v45 = vld [vmem:[%s3359_s9 + $0x168] sm:$0xff]  }
 0x2d3   : > { %v2757_v46 = vld [vmem:[%s3359_s9 + $0x1c8] sm:$0xff]  }
 0x2d5   : > { %2556 = vmatpush3.bf16.msra.mxu1 %v2730_v48  ;;  %2570 = vmatpush3.bf16.msra.mxu0 %v2731_v49  ;;  %v1222_v48 = vrot.slane %v2806_v1, %v1221_v33  ;;  %v1209_v49 = vsub.s32 4, %v2980_v44 }
 0x2d6   : > { %2557 = vmatprep.subr.bf16.mxu1 %v2732_v50  ;;  %2571 = vmatprep.subr.bf16.mxu0 %v2733_v51  ;;  %v2758_v50 = vld [vmem:[%s3359_s9 + $0x128] sm:$0xff]  }
 0x2d7   : > { %v2759_v51 = vld [vmem:[%s3359_s9 + $0x188] sm:$0xff]  }
 0x2d9   : > { %2558 = vmatpush3.bf16.msra.mxu1 %v2734_v52  ;;  %2572 = vmatpush3.bf16.msra.mxu0 %v2735_v53  ;;  %v2760_v53 = vld [vmem:[%s3359_s9 + $0x170] sm:$0xff]  }
 0x2da   : > { %2573 = vmatprep.subr.bf16.mxu0 %v2736_v54  ;;  %2587 = vmatprep.subr.bf16.mxu1 %v2737_v55  ;;  %v2761_v54 = vld [vmem:[%s3359_s9 + $0x1d0] sm:$0xff]  }
 0x2dd   : > { %2574 = vmatpush3.bf16.msra.mxu0 %v2738_v56 }
 0x2de   : > { %2575 = vmatprep.subr.bf16.mxu0 %v2740_v57 }
 0x2e1   : > { %2576 = vmatpush3.bf16.msra.mxu0 %v2742_v58  ;;  %v1210_v58 = vrot.slane %v2806_v1, %v1209_v49 }
 0x2e2   : > { %2577 = vmatprep.subr.bf16.mxu0 %v2744_v59 }
 0x2e5   : > { %2578 = vmatpush3.bf16.msra.mxu0 %v2746_v60  ;;  %v2762_v60 = vld [vmem:[%s3359_s9 + $0x130] sm:$0xff]  }
 0x2e6   : > { %2579 = vmatprep.subr.bf16.mxu0 %v2748_v61  ;;  %v2763_v61 = vld [vmem:[%s3359_s9 + $0x190] sm:$0xff]  }
 0x2e9   : > { %2580 = vmatpush3.bf16.msra.mxu0 %v2750_v62 }
 0x2ea   : > { %2609 = vmatprep.subr.bf16.mxu0 %v2753_v63  ;;  %v2764_v63 = vld [vmem:[%s3359_s9 + $0x178] sm:$0xff]  }
 0x387   : > { %v1294_v5 = vpop.f32.mrb[20].mxu1 }
 0x388   : > { %v1295_v6 = vadd.f32 %v1294_v5, %v1194_v3  ;;  %v1296_v7 = vpop.f32.mrb[21].mxu1  ;;  %v2766_v3 = vld [vmem:[%s3359_s9 + $0x138] sm:$0xff]   ;;  %v2768_v5 = vld [vmem:[%s3359_s9 + $0x1e0] sm:$0xff]  }
 0x389   : > { %v1297_v8 = vadd.f32 %v1296_v7, %v1198_v4  ;;  %v1298_v9 = vpop.f32.mrb[22].mxu1  ;;  %v2767_v4 = vld [vmem:[%s3359_s9 + $0x198] sm:$0xff]   ;;  %v2769_v7 = vld [vmem:[%s3359_s9 + $0x1a0] sm:$0xff]  }
 0x38a   : > { %v1490_v11 = vpack.c.bf16 %v1295_v6, %v1295_v6  ;;  %v1299_v12 = vpop.f32.mrb[23].mxu1  ;;  %v2771_v9 = vld [vmem:[%s3359_s9 + $0x1e8] sm:$0xff]  }
 0x38b   : > { %v1491_v13 = vpack.c.bf16 %v1297_v8, %v1297_v8  ;;  %v2770_v8 = vld [vmem:[%s3358_s8] sm:$0xff]   ;;  %v2774_v12 = vld [vmem:[%s3359_s9 + $0x1f0] sm:$0xff]  }
 0x38d   : > { %2042 = vmatprep.mubr.bf16.mxu1 %v1491_v13  ;;  %v1217_v13 = vsub.s32 6, %v2980_v44  ;;  %v2777_v44 = vld [vmem:[%s3359_s9 + $0x1b8] sm:$0xff]  }
 0x38e   : > { %2043 = vmatmul.mubr.bf16.vlgmr.msra.gmra.mrb[28].mxu1 %v1490_v11  ;;  %v2773_v11 = vld [vmem:[%s3358_s8 + $0x8] sm:$0xff]  }
 0x38f   : > { %2588 = vmatpush3.bf16.msra.mxu1 %v2739_v14  ;;  %v3204_v18 = vpop.f32.mrb[24].mxu1  ;;  %v2775_v14 = vld [vmem:[%s3359_s9 + $0x1b0] sm:$0xff]  }
 0x390   : > { %2589 = vmatprep.subr.bf16.mxu1 %v2741_v15  ;;  %v1378_v21 = vpop.f32.mrb[25].mxu1  ;;  %v1377_v2 = vadd.f32 %v3204_v18, %v1210_v58  ;;  %v1485_v15 = vpack.c.bf16 %v2982_v47, %v2982_v47  ;;  %v2778_v47 = vld [vmem:[%s3361_s11] sm:$0xff]  }
 0x391   : > { %v1379_v23 = vadd.f32 %v1378_v21, %v1214_v16  ;;  %v1380_v24 = vpop.f32.mrb[26].mxu1  ;;  %v1218_v16 = vrot.slane %v2806_v1, %v1217_v13  ;;  %v2780_v21 = vld [vmem:[%s3361_s11 + $0x10] sm:$0xff]  }
 0x392   : > { %v1381_v25 = vpop.f32.mrb[27].mxu1  ;;  %v1494_v6 = vpack.c.bf16 %v1377_v2, %v1377_v2 }
 0x393   : > { %2590 = vmatpush3.bf16.msra.mxu1 %v2743_v17  ;;  %v1495_v27 = vpack.c.bf16 %v1379_v23, %v1379_v23  ;;  %v2776_v17 = vld [vmem:[%s3359_s9 + $0x1f8] sm:$0xff]  }
 0x394   : > { %2591 = vmatprep.subr.bf16.mxu1 %v2745_v19 }
 0x395   : > { %2122 = vmatprep.mubr.bf16.mxu1 %v1495_v27 }
 0x397   : > { %2592 = vmatpush3.bf16.msra.mxu1 %v2747_v26  ;;  %v1335_v31 = vpop.f32.mrb[20].mxu0 }
 0x398   : > { %v1336_v34 = vadd.f32 %v1335_v31, %v1202_v28  ;;  %v1337_v35 = vpop.f32.mrb[21].mxu0  ;;  %2593 = vmatprep.subr.bf16.mxu1 %v2749_v29 }
 0x399   : > { %v1338_v37 = vadd.f32 %v1337_v35, %v1206_v30  ;;  %v1339_v38 = vpop.f32.mrb[22].mxu0 }
 0x39a   : > { %v1340_v39 = vpop.f32.mrb[23].mxu0  ;;  %v1492_v43 = vpack.c.bf16 %v1336_v34, %v1336_v34 }
 0x39b   : > { %v1493_v40 = vpack.c.bf16 %v1338_v37, %v1338_v37  ;;  %2594 = vmatpush3.bf16.msra.mxu1 %v2751_v32 }
 0x39c   : > { %2595 = vmatprep.subr.bf16.mxu1 %v2752_v36 }
 0x39d   : > { %2082 = vmatprep.mubr.bf16.mxu0 %v1493_v40 }
 0x39e   : > { %2083 = vmatmul.mubr.bf16.vlgmr.msra.gmra.mrb[28].mxu0 %v1492_v43 }
 0x39f   : > { %2596 = vmatpush3.bf16.msra.mxu1 %v2754_v41  ;;  %2610 = vmatpush3.bf16.msra.mxu0 %v2755_v42  ;;  %v1417_v52 = vpop.f32.mrb[24].mxu0 }
 0x3a0   : > { %2597 = vmatprep.subr.bf16.mxu1 %v2756_v45  ;;  %2611 = vmatprep.subr.bf16.mxu0 %v2757_v46  ;;  %v1419_v55 = vpop.f32.mrb[25].mxu0  ;;  %v1418_v18 = vadd.f32 %v1417_v52, %v1218_v16 }
 0x3a1   : > { %v1420_v56 = vadd.f32 %v1419_v55, %v1222_v48  ;;  %v1421_v57 = vpop.f32.mrb[26].mxu0 }
 0x3a2   : > { %v1422_v59 = vpop.f32.mrb[27].mxu0  ;;  %v1496_v19 = vpack.c.bf16 %v1418_v18, %v1418_v18 }
 0x3a3   : > { %2598 = vmatpush3.bf16.msra.mxu1 %v2758_v50  ;;  %2612 = vmatpush3.bf16.msra.mxu0 %v2759_v51  ;;  %v1497_v62 = vpack.c.bf16 %v1420_v56, %v1420_v56  ;;  %v2526_v51 = vld [vmem:[%s3360_s10] ss:$0 sm:$0xff] }
 0x3a4   : > { %2599 = vmatprep.subr.bf16.mxu1 %v2760_v53  ;;  %2613 = vmatprep.subr.bf16.mxu0 %v2761_v54  ;;  %v2527_v56 = vld [vmem:[%s3362_s12] ss:$0 sm:$0xff] }
 0x3a5   : > { %2162 = vmatprep.mubr.bf16.mxu0 %v1497_v62 }
 0x3a7   : > { %2600 = vmatpush3.bf16.msra.mxu1 %v2762_v60  ;;  %2614 = vmatpush3.bf16.msra.mxu0 %v2763_v61 }
 0x3a8   : > { %2601 = vmatprep.subr.bf16.mxu1 %v2764_v63  ;;  %2615 = vmatprep.subr.bf16.mxu0 %v2765_v0 }
 0x3ab   : > { %2602 = vmatpush3.bf16.msra.mxu1 %v2766_v3  ;;  %2616 = vmatpush3.bf16.msra.mxu0 %v2767_v4 }
 0x3ac   : > { %2617 = vmatprep.subr.bf16.mxu0 %v2768_v5  ;;  %2659 = vmatprep.subr.bf16.mxu1 %v2806_v1 }
 0x3ae   : > { %2123 = vmatmul.mubr.bf16.vlgmr.msra.gmra.mrb[32].mxu1 %v1494_v6 }
 0x3af   : > { %2618 = vmatpush3.bf16.msra.mxu0 %v2769_v7  ;;  %2660 = vmatpush3.bf16.msra.mxu1 %v2770_v8 }
 0x3b0   : > { %2619 = vmatprep.subr.bf16.mxu0 %v2771_v9  ;;  %2661 = vmatprep.subr.bf16.mxu1 %v2806_v1 }
 0x3b1   : > { %2663 = vmatprep.mubr.msk.bf16.mxu1 %vm2807_vm0, %v2806_v1 }
 0x3b3   : > { %2620 = vmatpush3.bf16.msra.mxu0 %v2772_v10  ;;  %2662 = vmatpush3.bf16.msra.mxu1 %v2773_v11 }
 0x3b4   : > { %2621 = vmatprep.subr.bf16.mxu0 %v2774_v12 }
 0x3b6   : > { %2664 = vmatmul.mubr.msk.bf16.vlgmr.msra.gmra.mrb[36].mxu1 %vm500_vm1, %v1485_v15 }
 0x3b7   : > { %2622 = vmatpush3.bf16.msra.mxu0 %v2775_v14 }
 0x3b8   : > { %2623 = vmatprep.subr.bf16.mxu0 %v2776_v17 }
 0x3bb   : > { %2624 = vmatpush3.bf16.msra.mxu0 %v2777_v44 }
 0x3bc   : > { %2667 = vmatprep.subr.bf16.mxu0 %v2806_v1 }
 0x3be   : > { %2163 = vmatmul.mubr.bf16.vlgmr.msra.gmra.mrb[32].mxu0 %v1496_v19 }
 0x3bf   : > { %2675 = vmatprep.mubr.msk.bf16.mxu0 %vm2807_vm0, %v2806_v1  ;;  %2668 = vmatpush3.bf16.msra.mxu0 %v2778_v47 }
 0x3c0   : > { %2669 = vmatprep.subr.bf16.mxu0 %v2806_v1 }
 0x3c3   : > { %2670 = vmatpush3.bf16.msra.mxu0 %v2779_v20 }
 0x3c4   : > { %2671 = vmatprep.subr.bf16.mxu0 %v2806_v1 }
 0x3c7   : > { %2672 = vmatpush3.bf16.msra.mxu0 %v2780_v21 }
 0x3c8   : > { %2673 = vmatprep.subr.bf16.mxu0 %v2806_v1 }
 0x3cb   : > { %2674 = vmatpush3.bf16.msra.mxu0 %v2781_v22 }
 0x461   : > { %v2559_v23 = vpop.f32.mrb[28].mxu1 }
 0x462   : > { %v2560_v24 = vpop.f32.mrb[29].mxu1 }
 0x463   : > { %v2561_v25 = vadd.f32 %v2560_v24, %v2559_v23  ;;  %v2562_v26 = vpop.f32.mrb[30].mxu1 }
 0x464   : > { %v2563_v27 = vpop.f32.mrb[31].mxu1 }
 0x471   : > { %v2581_v28 = vpop.f32.mrb[28].mxu0 }
 0x472   : > { %v2582_v29 = vpop.f32.mrb[29].mxu0 }
 0x473   : > { %v2583_v30 = vadd.f32 %v2582_v29, %v2581_v28  ;;  %v2584_v31 = vpop.f32.mrb[30].mxu0 }
 0x474   : > { %v2585_v32 = vpop.f32.mrb[31].mxu0 }
 0x475   : > { %v2085_v34 = vadd.f32 %v2583_v30, %v2561_v25 }
 0x481   : > { %v2603_v35 = vpop.f32.mrb[32].mxu1 }
 0x482   : > { %v2604_v36 = vpop.f32.mrb[33].mxu1 }
 0x483   : > { %v2605_v37 = vadd.f32 %v2604_v36, %v2603_v35  ;;  %v2606_v1 = vpop.f32.mrb[34].mxu1 }
 0x484   : > { %v2607_v38 = vpop.f32.mrb[35].mxu1 }
 0x485   : > { %v2125_v33 = vadd.f32 %v2605_v37, %v2085_v34 }
 0x489   : > { %v2219_v39 = vpop.f32.mrb[36].mxu1 }
 0x48a   : > { %v2665_v40 = vpop.f32.mrb[37].mxu1 }
 0x48b   : > { %v2222_v41 = vpop.f32.mrb[38].mxu1 }
 0x48c   : > { %v2666_v42 = vpop.f32.mrb[39].mxu1 }
 0x491   : > { %v2625_v43 = vpop.f32.mrb[32].mxu0 }
 0x492   : > { %v2626_v45 = vpop.f32.mrb[33].mxu0 }
 0x493   : > { %v2627_v46 = vadd.f32 %v2626_v45, %v2625_v43  ;;  %v2628_v48 = vpop.f32.mrb[34].mxu0 }
 0x494   : > { %v2629_v49 = vpop.f32.mrb[35].mxu0 }
 0x495   : > { %v2165_v50 = vadd.f32 %v2627_v46, %v2125_v33 }
 0x497   : > { %v2220_v52 = vadd.f32 %v2219_v39, %v2165_v50 }
 0x499   : > { %v2232_v53 = vadd.f32 %v2526_v51, %v2220_v52 }
 0x49b   : > { %v2233_v54 = vmax.f32 %v2232_v53, 0.0 }
 0x49d   : > { %v2234_v55 = vpack.c.bf16 %v2233_v54, %v2233_v54 }
 0x49f   : > { %2676 = vmatmul.mubr.msk.bf16.vlgmr.msra.gmra.mrb[36].mxu0 %vm585_vm3, %v2234_v55 }
 0x572   : > { %v2311_v57 = vpop.f32.mrb[36].mxu0 }
 0x573   : > { %v2312_v58 = vadd.f32 %v2527_v56, %v2311_v57  ;;  %v2677_v59 = vpop.f32.mrb[37].mxu0 }
 0x574   : > { %v2314_v60 = vpop.f32.mrb[38].mxu0 }
 0x575   : > { %2318 = vst.msk [vmem:[%s466_s15] sm:$0xff] %vm2317_vm8, %v2312_v58  ;;  %v2678_v61 = vpop.f32.mrb[39].mxu0 }
 0x576 PF: > { %s23_s27 = sadd.s32 1, %s2804_s27   ;;  %s3364_s25 = smov %s2800_s26 }
 0x577   : > { %p20_p5 = scmp.ge.s32.totalorder %s23_s27, 4   ;;  %s3365_s26 = smov %s3367_s28 }
 0x579   :  { %22 = sbr.rel (!%p20_p5) target bundleno = 2 (0x2), region = 106 }

</bundles_post_ra>
